<compile_context>
chip_gen: v5e
topology: v5e:2x2
jax: 0.10.0
libtpu: 0.0.40
codegen_flags: <defaults>
</compile_context>

<pallas_src>
import jax
import jax.numpy as jnp
import numpy as np
from jax.experimental import pallas as pl
from jax.experimental.pallas import tpu as pltpu


def _round_up(x, m):
    return (x + m - 1) // m * m


def _vmem_capacity_bytes():
    try:
        info = pltpu.get_tpu_info()
        return int(getattr(info, "vmem_capacity_bytes", 64 << 20))
    except Exception:
        return 64 << 20


# ----------------------------- parameter setup ------------------------------
def init_params(key, in_planes, out_planes, kernel_size, kernel_num,
                reduction=0.0625, min_channel=16):
    attn_ch = max(int(in_planes * reduction), min_channel)
    ks = jax.random.split(key, 6)

    def normal(k, shape, fan_out):
        return (jax.random.normal(k, shape, jnp.float32)
                * np.float32(np.sqrt(2.0 / fan_out)))

    params = {
        # main dynamic-conv bank: (kernel_num, out_planes, in_planes, K)
        "weight": normal(ks[0], (kernel_num, out_planes, in_planes, kernel_size),
                         out_planes * kernel_size),
        # attention trunk: 1x1 conv (no bias) == linear (attn_ch, in_planes)
        "fc_w": normal(ks[1], (attn_ch, in_planes), attn_ch),
        # four heads (1x1 convs with bias == linears)
        "ch_w": normal(ks[2], (in_planes, attn_ch), in_planes),
        "ch_b": jnp.zeros((in_planes,), jnp.float32),
        "fil_w": normal(ks[3], (out_planes, attn_ch), out_planes),
        "fil_b": jnp.zeros((out_planes,), jnp.float32),
        "sp_w": normal(ks[4], (kernel_size, attn_ch), kernel_size),
        "sp_b": jnp.zeros((kernel_size,), jnp.float32),
        "kn_w": normal(ks[5], (kernel_num, attn_ch), kernel_num),
        "kn_b": jnp.zeros((kernel_num,), jnp.float32),
    }
    return params


# ------------------------- attention (tiny, plain JAX glue) -----------------
def attention_forward(x_ncl, params, temperature=1.0):
    # x_ncl: (B, C_in, L)
    pooled = jnp.mean(x_ncl, axis=-1)                     # AdaptiveAvgPool1d(1)
    h = pooled @ params["fc_w"].T                         # (B, attn_ch)
    # TODO(synk): BatchNorm1d in eval mode with default running stats (mean=0,
    # var=1, gamma=1, beta=0); trained stats would change this.
    h = h * np.float32(1.0 / np.sqrt(1.0 + 1e-5))
    h = jax.nn.relu(h)
    t = np.float32(1.0 / temperature)
    ch = jax.nn.sigmoid((h @ params["ch_w"].T + params["ch_b"]) * t)     # (B, C_in)
    fil = jax.nn.sigmoid((h @ params["fil_w"].T + params["fil_b"]) * t)  # (B, C_out)
    sp = jax.nn.sigmoid((h @ params["sp_w"].T + params["sp_b"]) * t)     # (B, K)
    kn = jax.nn.softmax((h @ params["kn_w"].T + params["kn_b"]) * t, axis=-1)  # (B, N)
    return ch, fil, sp, kn


# --------------------------------- kernel ------------------------------------
def _make_kernel(c_in_pad, c_out_pad, k_size, dilation, l_tile, l_win, use_im2col):
    def kernel(x_hbm, w_ref, o_ref, xbuf, sem, work_ref):
        # x_hbm:    (B, c_in_pad, l_in_pad)  in HBM (manual halo-window DMA)
        # w_ref:    im2col: (1, c_out_pad, K*c_in_pad)  else (1, K, c_out_pad, c_in_pad)
        #           per-batch effective weight (VMEM-resident across l tiles)
        # o_ref:    (1, c_out_pad, l_tile)   lane-dense output tile
        # xbuf:     (2, c_in_pad, l_win)     halo-window double buffer
        # sem:      DMA semaphores (2,)
        # work_ref: im2col slab (K*c_in_pad, l_tile) OR f32 acc (c_out_pad, l_tile)
        b = pl.program_id(0)
        l = pl.program_id(1)
        n_l = pl.num_programs(1)
        slot = l % 2

        def window_copy(tile_idx, buf_slot):
            start = pl.multiple_of(tile_idx * l_tile, l_tile)
            return pltpu.make_async_copy(
                x_hbm.at[b, :, pl.ds(start, l_win)],
                xbuf.at[buf_slot],
                sem.at[buf_slot])

        # Prime the pipeline on the first L tile of each batch row.
        @pl.when(l == 0)
        def _():
            window_copy(l, slot).start()

        # Wait for this tile's halo window.
        window_copy(l, slot).wait()

        # Prefetch the next tile's window while we compute on this one.
        @pl.when(l + 1 < n_l)
        def _():
            window_copy(l + 1, 1 - slot).start()

        if use_im2col:
            # Small c_in: fuse the K taps into one MXU dot via an im2col slab.
            for k in range(k_size):
                work_ref[k * c_in_pad:(k + 1) * c_in_pad, :] = (
                    xbuf[slot, :, k * dilation:k * dilation + l_tile])
            o_ref[0] = jnp.dot(
                w_ref[0], work_ref[...],
                preferred_element_type=jnp.float32).astype(o_ref.dtype)
        else:
            # Large c_in: K accumulating matmuls on shifted views, no im2col copy.
            for k in range(k_size):
                part = jnp.dot(
                    w_ref[0, k],
                    xbuf[slot, :, k * dilation:k * dilation + l_tile],
                    preferred_element_type=jnp.float32)
                if k == 0:
                    work_ref[...] = part
                else:
                    work_ref[...] = work_ref[...] + part
            o_ref[0] = work_ref[...].astype(o_ref.dtype)

    return kernel


# ------------------------------- wrapper --------------------------------------
def odconv1d_forward(x_blc, params, *, stride=1, padding=0, dilation=1,
                     temperature=1.0, compute_dtype=jnp.bfloat16,
                     out_dtype=None, l_tile=None):
    # x_blc: (B, L, C_in) -- the PyTorch module itself permutes to (B, C_in, L).
    assert stride == 1, "TODO(synk): strided conv not implemented in the kernel"
    B, L, c_in = x_blc.shape
    weight = params["weight"]                              # (N, C_out, C_in, K)
    _, c_out, _, k_size = weight.shape
    if out_dtype is None:
        out_dtype = compute_dtype

    x = jnp.transpose(x_blc, (0, 2, 1))                    # (B, C_in, L)
    ch, fil, sp, kn = attention_forward(x, params, temperature)

    halo = dilation * (k_size - 1)
    assert halo <= 128, "TODO(synk): halo-window design assumes dilation*(K-1) <= 128"
    l_out = L + 2 * padding - halo
    assert l_out > 0, "kernel does not cover the (padded) input"

    # Fold kernel/spatial/channel/filter attentions into a per-batch weight:
    #   W_eff[b,o,c,k] = fil[b,o] * ch[b,c] * sum_n kn[b,n]*sp[b,k]*W[n,o,c,k]
    w_agg = jnp.einsum("bn,bk,nock->bock", kn, sp, weight)          # (B,Cout,Cin,K)
    w_eff = w_agg * fil[:, :, None, None] * ch[:, None, :, None]

    # Pad channel dims to a sublane multiple (16 covers f32 sublane=8, bf16=16).
    SUB = 16
    c_in_pad = _round_up(c_in, SUB)
    c_out_pad = _round_up(c_out, SUB)
    w_eff = jnp.pad(w_eff, ((0, 0), (0, c_out_pad - c_out),
                            (0, c_in_pad - c_in), (0, 0)))

    itemsize = jnp.dtype(compute_dtype).itemsize
    out_itemsize = jnp.dtype(out_dtype).itemsize
    use_im2col = c_in_pad < 128    # large c_in: skip the VMEM->VMEM im2col copy

    if use_im2col:
        # K-major, c_in-minor to match the in-kernel im2col row order.
        w_eff = jnp.transpose(w_eff, (0, 1, 3, 2)).reshape(
            B, c_out_pad, k_size * c_in_pad)
    else:
        # Per-tap layout: (B, K, C_out, C_in) -- no lane-misaligned weight slices.
        w_eff = jnp.transpose(w_eff, (0, 3, 1, 2))
    w_eff = w_eff.astype(compute_dtype)

    # ---- tile selection & VMEM budget (bounded by tile, not by L) ----
    vmem_cap = _vmem_capacity_bytes()

    def vmem_needed(lt):
        lw = lt + 128
        w_blk = c_out_pad * k_size * c_in_pad * itemsize
        o_blk = c_out_pad * lt * out_itemsize
        xbuf_b = 2 * c_in_pad * lw * itemsize
        work_b = (k_size * c_in_pad * lt * itemsize) if use_im2col \
            else (c_out_pad * lt * 4)
        # w / out blocks are double-buffered by the pipeline; scratch is not.
        return 2 * (w_blk + o_blk) + xbuf_b + work_b

    if l_tile is None:
        l_tile = 1024 if vmem_cap <= (64 << 20) else 2048   # v7x vs v5e/v6e
    l_tile = max(128, _round_up(min(l_tile, _round_up(l_out, 128)), 128))
    while l_tile > 128 and vmem_needed(l_tile) > vmem_cap // 2:
        l_tile = max(128, _round_up(l_tile // 2, 128))

    n_l = -(-l_out // l_tile)
    l_out_pad = n_l * l_tile
    l_win = l_tile + 128                   # halo window width (halo <= 128)
    l_in_pad = l_out_pad + 128             # every window stays in bounds

    # Left pad = conv padding; right pad = alignment zeros (only feed output
    # positions >= l_out, which are sliced off).
    x_pad = jnp.pad(x, ((0, 0), (0, c_in_pad - c_in),
                        (padding, l_in_pad - L - padding)))
    x_pad = x_pad.astype(compute_dtype)

    kernel = _make_kernel(c_in_pad, c_out_pad, k_size, dilation, l_tile, l_win,
                          use_im2col)

    work_scratch = (pltpu.VMEM((k_size * c_in_pad, l_tile), compute_dtype)
                    if use_im2col else
                    pltpu.VMEM((c_out_pad, l_tile), jnp.float32))

    if use_im2col:
        w_spec = pl.BlockSpec((1, c_out_pad, k_size * c_in_pad),
                              lambda b, l: (b, 0, 0))
    else:
        w_spec = pl.BlockSpec((1, k_size, c_out_pad, c_in_pad),
                              lambda b, l: (b, 0, 0, 0))

    # No 2x fudge (vmem_needed already counts the double buffers); ~25% headroom
    # for compiler-internal scratch, capped at 3/4 of physical VMEM.
    vmem_limit = int(min(max(vmem_needed(l_tile) + (4 << 20), 16 << 20),
                         (vmem_cap * 3) // 4))

    cost = pl.CostEstimate(
        flops=2 * B * c_out_pad * k_size * c_in_pad * l_out_pad,
        transcendentals=0,
        bytes_accessed=(B * n_l * c_in_pad * l_win * itemsize
                        + B * c_out_pad * k_size * c_in_pad * itemsize
                        + B * c_out_pad * l_out_pad * out_itemsize),
    )

    out = pl.pallas_call(
        kernel,
        out_shape=jax.ShapeDtypeStruct((B, c_out_pad, l_out_pad), out_dtype),
        grid_spec=pltpu.PrefetchScalarGridSpec(
            num_scalar_prefetch=0,
            grid=(B, n_l),
            in_specs=[
                pl.BlockSpec(memory_space=pl.ANY),       # x stays in HBM
                w_spec,                                  # W_eff[b] resident over l
            ],
            out_specs=pl.BlockSpec((1, c_out_pad, l_tile), lambda b, l: (b, 0, l)),
            scratch_shapes=[
                pltpu.VMEM((2, c_in_pad, l_win), compute_dtype),  # halo double buffer
                pltpu.SemaphoreType.DMA((2,)),
                work_scratch,
            ],
        ),
        compiler_params=pltpu.CompilerParams(
            # B is megacore-sharded; l must stay sequential for the halo prefetch.
            dimension_semantics=("parallel", "arbitrary"),
            vmem_limit_bytes=vmem_limit),
        cost_estimate=cost,
    )(x_pad, w_eff)

    return out[:, :c_out, :l_out]


# ------------------------- pure-JAX reference (check) -------------------------
def odconv1d_reference(x_blc, params, *, padding=0, dilation=1, temperature=1.0):
    # Follows the PyTorch module's order of operations (no weight folding).
    x = jnp.transpose(x_blc, (0, 2, 1))
    ch, fil, sp, kn = attention_forward(x, params, temperature)
    weight = params["weight"]
    B, c_in, L = x.shape
    _, c_out, _, k_size = weight.shape
    l_out = L + 2 * padding - dilation * (k_size - 1)
    xs = x * ch[:, :, None]
    xs = jnp.pad(xs, ((0, 0), (0, 0), (padding, padding)))
    w_agg = jnp.einsum("bn,bk,nock->bock", kn, sp, weight)   # (B, C_out, C_in, K)
    out = jnp.zeros((B, c_out, l_out), jnp.float32)
    for k in range(k_size):
        out = out + jnp.einsum("boc,bcl->bol", w_agg[..., k],
                               xs[:, :, k * dilation:k * dilation + l_out])
    return out * fil[:, :, None]


# ---------------------------------- main ---------------------------------------
if __name__ == "__main__":
    key = jax.random.PRNGKey(0)
    k_x, k_p, k_x2, k_p2 = jax.random.split(key, 4)

    # ---- case 1: small channels -> fused im2col path ----
    B, L, C_IN, C_OUT, K, N_KERN = 2, 16, 4, 8, 3, 4
    PAD, DIL = 1, 1
    params = init_params(k_p, C_IN, C_OUT, K, N_KERN)
    x = jax.random.normal(k_x, (B, L, C_IN), jnp.float32)   # (batch, length, channels)

    ref = odconv1d_reference(x, params, padding=PAD, dilation=DIL)

    # float32 path: tight numerical check of the kernel structure.
    out_f32 = odconv1d_forward(x, params, padding=PAD, dilation=DIL,
                               compute_dtype=jnp.float32, out_dtype=jnp.float32)
    out_f32 = jax.block_until_ready(out_f32)
    np.testing.assert_allclose(np.asarray(out_f32), np.asarray(ref),
                               rtol=2e-3, atol=2e-3)

    # bfloat16 MXU path (default / fast, bf16 output): loose check.
    out_bf16 = odconv1d_forward(x, params, padding=PAD, dilation=DIL)
    out_bf16 = jax.block_until_ready(out_bf16)
    np.testing.assert_allclose(np.asarray(out_bf16.astype(jnp.float32)),
                               np.asarray(ref), rtol=4e-2, atol=4e-2)

    # ---- case 2: larger c_in -> direct (no-im2col) accumulate path ----
    B2, L2, C_IN2, C_OUT2, K2, N2 = 1, 192, 128, 16, 3, 2
    params2 = init_params(k_p2, C_IN2, C_OUT2, K2, N2)
    x2 = jax.random.normal(k_x2, (B2, L2, C_IN2), jnp.float32)
    ref2 = odconv1d_reference(x2, params2, padding=1, dilation=1)
    out2 = odconv1d_forward(x2, params2, padding=1, dilation=1,
                            compute_dtype=jnp.float32, out_dtype=jnp.float32)
    out2 = jax.block_until_ready(out2)
    np.testing.assert_allclose(np.asarray(out2), np.asarray(ref2),
                               rtol=2e-3, atol=2e-3)

    print("KERNEL_OK")
</pallas_src>

<mosaic_0001>
module attributes {stable_mosaic.version = 11 : i64} {
  func.func @kernel(%arg0: i32, %arg1: i32, %arg2: memref<2x16x256xf32, #tpu.memory_space<any>>, %arg3: memref<1x16x48xf32, #tpu.memory_space<vmem>>, %arg4: memref<1x16x128xf32, #tpu.memory_space<vmem>>, %arg5: memref<2x16x256xf32, #tpu.memory_space<vmem>>, %arg6: memref<2x!tpu.dma_semaphore, #tpu.memory_space<semaphore_mem>>, %arg7: memref<48x128xf32, #tpu.memory_space<vmem>>) attributes {dimension_semantics = [#tpu.dimension_semantics<parallel>, #tpu.dimension_semantics<arbitrary>], iteration_bounds = array<i64: 2, 1>, scalar_prefetch = 0 : i64, scratch_operands = 3 : i64, tpu.core_type = #tpu.core_type<tc>, window_params = [{}, {transform_indices = @transform_1, window_bounds = array<i64: 1, 16, 48>}, {transform_indices = @transform_2, window_bounds = array<i64: 1, 16, 128>}]} {
    %c2_i32 = arith.constant 2 : i32
    %c0_i32 = arith.constant 0 : i32
    %0 = arith.cmpi eq, %c2_i32, %c0_i32 : i32
    %c1_i32 = arith.constant 1 : i32
    %1 = arith.select %0, %c1_i32, %c2_i32 : i32
    %2 = arith.remsi %arg1, %1 : i32
    %c0_i32_0 = arith.constant 0 : i32
    %3 = arith.cmpi ne, %2, %c0_i32_0 : i32
    %c0_i32_1 = arith.constant 0 : i32
    %4 = arith.cmpi slt, %2, %c0_i32_1 : i32
    %c0_i32_2 = arith.constant 0 : i32
    %5 = arith.cmpi slt, %1, %c0_i32_2 : i32
    %6 = arith.xori %4, %5 : i1
    %7 = arith.andi %6, %3 : i1
    %8 = arith.addi %2, %1 : i32
    %9 = arith.select %7, %8, %2 : i32
    %c0_i32_3 = arith.constant 0 : i32
    %10 = arith.cmpi eq, %arg1, %c0_i32_3 : i32
    %11 = arith.extui %10 : i1 to i32
    %c0_i32_4 = arith.constant 0 : i32
    %12 = arith.cmpi ne, %11, %c0_i32_4 : i32
    scf.if %12 {
      %c128_i32_26 = arith.constant 128 : i32
      %44 = arith.muli %arg1, %c128_i32_26 : i32
      %45 = tpu.assume_multiple %44, 128 : i32
      %c0_i32_27 = arith.constant 0 : i32
      %46 = tpu.memref_slice %arg2[%arg0, %c0_i32_27, %45] : memref<2x16x256xf32, #tpu.memory_space<any>> -> memref<1x16x256xf32, #tpu.memory_space<any>>
      %47 = tpu.memref_squeeze %46 : memref<1x16x256xf32, #tpu.memory_space<any>> -> memref<16x256xf32, #tpu.memory_space<any>>
      %c0_i32_28 = arith.constant 0 : i32
      %c0_i32_29 = arith.constant 0 : i32
      %48 = tpu.memref_slice %arg5[%9, %c0_i32_28, %c0_i32_29] : memref<2x16x256xf32, #tpu.memory_space<vmem>> -> memref<1x16x256xf32, #tpu.memory_space<vmem>>
      %49 = tpu.memref_squeeze %48 : memref<1x16x256xf32, #tpu.memory_space<vmem>> -> memref<16x256xf32, #tpu.memory_space<vmem>>
      %50 = tpu.memref_slice %arg6[%9] : memref<2x!tpu.dma_semaphore, #tpu.memory_space<semaphore_mem>> -> memref<1x!tpu.dma_semaphore, #tpu.memory_space<semaphore_mem>>
      %51 = tpu.memref_squeeze %50 : memref<1x!tpu.dma_semaphore, #tpu.memory_space<semaphore_mem>> -> memref<!tpu.dma_semaphore, #tpu.memory_space<semaphore_mem>>
      tpu.enqueue_dma source(%47 : memref<16x256xf32, #tpu.memory_space<any>>) target(%49 : memref<16x256xf32, #tpu.memory_space<vmem>>) target_semaphore(%51 : memref<!tpu.dma_semaphore, #tpu.memory_space<semaphore_mem>>)
    } else {
    }
    %c128_i32 = arith.constant 128 : i32
    %13 = arith.muli %arg1, %c128_i32 : i32
    %14 = tpu.assume_multiple %13, 128 : i32
    %c0_i32_5 = arith.constant 0 : i32
    %15 = tpu.memref_slice %arg2[%arg0, %c0_i32_5, %14] : memref<2x16x256xf32, #tpu.memory_space<any>> -> memref<1x16x256xf32, #tpu.memory_space<any>>
    %16 = tpu.memref_squeeze %15 : memref<1x16x256xf32, #tpu.memory_space<any>> -> memref<16x256xf32, #tpu.memory_space<any>>
    %c0_i32_6 = arith.constant 0 : i32
    %c0_i32_7 = arith.constant 0 : i32
    %17 = tpu.memref_slice %arg5[%9, %c0_i32_6, %c0_i32_7] : memref<2x16x256xf32, #tpu.memory_space<vmem>> -> memref<1x16x256xf32, #tpu.memory_space<vmem>>
    %18 = tpu.memref_squeeze %17 : memref<1x16x256xf32, #tpu.memory_space<vmem>> -> memref<16x256xf32, #tpu.memory_space<vmem>>
    %19 = tpu.memref_slice %arg6[%9] : memref<2x!tpu.dma_semaphore, #tpu.memory_space<semaphore_mem>> -> memref<1x!tpu.dma_semaphore, #tpu.memory_space<semaphore_mem>>
    %20 = tpu.memref_squeeze %19 : memref<1x!tpu.dma_semaphore, #tpu.memory_space<semaphore_mem>> -> memref<!tpu.dma_semaphore, #tpu.memory_space<semaphore_mem>>
    tpu.wait_dma2 semaphore(%20 : memref<!tpu.dma_semaphore, #tpu.memory_space<semaphore_mem>>) src(%16 : memref<16x256xf32, #tpu.memory_space<any>>) dst(%18 : memref<16x256xf32, #tpu.memory_space<vmem>>)
    %c1_i32_8 = arith.constant 1 : i32
    %21 = arith.addi %arg1, %c1_i32_8 : i32
    %c1_i32_9 = arith.constant 1 : i32
    %22 = arith.cmpi slt, %21, %c1_i32_9 : i32
    %23 = arith.extui %22 : i1 to i32
    %c0_i32_10 = arith.constant 0 : i32
    %24 = arith.cmpi ne, %23, %c0_i32_10 : i32
    scf.if %24 {
      %c1_i32_26 = arith.constant 1 : i32
      %44 = arith.addi %arg1, %c1_i32_26 : i32
      %c1_i32_27 = arith.constant 1 : i32
      %45 = arith.subi %c1_i32_27, %9 : i32
      %c128_i32_28 = arith.constant 128 : i32
      %46 = arith.muli %44, %c128_i32_28 : i32
      %47 = tpu.assume_multiple %46, 128 : i32
      %c0_i32_29 = arith.constant 0 : i32
      %48 = tpu.memref_slice %arg2[%arg0, %c0_i32_29, %47] : memref<2x16x256xf32, #tpu.memory_space<any>> -> memref<1x16x256xf32, #tpu.memory_space<any>>
      %49 = tpu.memref_squeeze %48 : memref<1x16x256xf32, #tpu.memory_space<any>> -> memref<16x256xf32, #tpu.memory_space<any>>
      %c0_i32_30 = arith.constant 0 : i32
      %c0_i32_31 = arith.constant 0 : i32
      %50 = tpu.memref_slice %arg5[%45, %c0_i32_30, %c0_i32_31] : memref<2x16x256xf32, #tpu.memory_space<vmem>> -> memref<1x16x256xf32, #tpu.memory_space<vmem>>
      %51 = tpu.memref_squeeze %50 : memref<1x16x256xf32, #tpu.memory_space<vmem>> -> memref<16x256xf32, #tpu.memory_space<vmem>>
      %52 = tpu.memref_slice %arg6[%45] : memref<2x!tpu.dma_semaphore, #tpu.memory_space<semaphore_mem>> -> memref<1x!tpu.dma_semaphore, #tpu.memory_space<semaphore_mem>>
      %53 = tpu.memref_squeeze %52 : memref<1x!tpu.dma_semaphore, #tpu.memory_space<semaphore_mem>> -> memref<!tpu.dma_semaphore, #tpu.memory_space<semaphore_mem>>
      tpu.enqueue_dma source(%49 : memref<16x256xf32, #tpu.memory_space<any>>) target(%51 : memref<16x256xf32, #tpu.memory_space<vmem>>) target_semaphore(%53 : memref<!tpu.dma_semaphore, #tpu.memory_space<semaphore_mem>>)
    } else {
    }
    %25 = arith.index_cast %9 : i32 to index
    %c0 = arith.constant 0 : index
    %c0_11 = arith.constant 0 : index
    %26 = vector.load %arg5[%25, %c0, %c0_11] : memref<2x16x256xf32, #tpu.memory_space<vmem>>, vector<1x16x128xf32>
    %27 = vector.shape_cast %26 : vector<1x16x128xf32> to vector<16x128xf32>
    %c0_12 = arith.constant 0 : index
    %c0_13 = arith.constant 0 : index
    %28 = vector.load %arg7[%c0_12, %c0_13] : memref<48x128xf32, #tpu.memory_space<vmem>>, vector<16x128xf32>
    tpu.vector_store %arg7[%c0_12, %c0_13], %27 {strides = array<i32>} : memref<48x128xf32, #tpu.memory_space<vmem>>, vector<16x128xf32>,
    %29 = arith.index_cast %9 : i32 to index
    %c0_14 = arith.constant 0 : index
    %c1 = arith.constant 1 : index
    %30 = vector.load %arg5[%29, %c0_14, %c1] : memref<2x16x256xf32, #tpu.memory_space<vmem>>, vector<1x16x128xf32>
    %31 = vector.shape_cast %30 : vector<1x16x128xf32> to vector<16x128xf32>
    %c16 = arith.constant 16 : index
    %c0_15 = arith.constant 0 : index
    %32 = vector.load %arg7[%c16, %c0_15] : memref<48x128xf32, #tpu.memory_space<vmem>>, vector<16x128xf32>
    tpu.vector_store %arg7[%c16, %c0_15], %31 {strides = array<i32>} : memref<48x128xf32, #tpu.memory_space<vmem>>, vector<16x128xf32>,
    %33 = arith.index_cast %9 : i32 to index
    %c0_16 = arith.constant 0 : index
    %c2 = arith.constant 2 : index
    %34 = vector.load %arg5[%33, %c0_16, %c2] : memref<2x16x256xf32, #tpu.memory_space<vmem>>, vector<1x16x128xf32>
    %35 = vector.shape_cast %34 : vector<1x16x128xf32> to vector<16x128xf32>
    %c32 = arith.constant 32 : index
    %c0_17 = arith.constant 0 : index
    %36 = vector.load %arg7[%c32, %c0_17] : memref<48x128xf32, #tpu.memory_space<vmem>>, vector<16x128xf32>
    tpu.vector_store %arg7[%c32, %c0_17], %35 {strides = array<i32>} : memref<48x128xf32, #tpu.memory_space<vmem>>, vector<16x128xf32>,
    %c0_18 = arith.constant 0 : index
    %c0_19 = arith.constant 0 : index
    %c0_20 = arith.constant 0 : index
    %37 = vector.load %arg3[%c0_18, %c0_19, %c0_20] : memref<1x16x48xf32, #tpu.memory_space<vmem>>, vector<1x16x48xf32>
    %38 = vector.shape_cast %37 : vector<1x16x48xf32> to vector<16x48xf32>
    %c0_21 = arith.constant 0 : index
    %c0_22 = arith.constant 0 : index
    %39 = vector.load %arg7[%c0_21, %c0_22] : memref<48x128xf32, #tpu.memory_space<vmem>>, vector<48x128xf32>
    %cst = arith.constant dense<0.000000e+00> : vector<16x128xf32>
    %40 = tpu.matmul %38, %39, %cst {dimension_numbers = #tpu.dot_dimension_numbers<[1], [0], [0], [1], [0, 0, 1, 1], [], []>} : vector<16x48xf32>, vector<48x128xf32>, vector<16x128xf32> -> vector<16x128xf32>
    %c0_23 = arith.constant 0 : index
    %c0_24 = arith.constant 0 : index
    %c0_25 = arith.constant 0 : index
    %41 = vector.load %arg4[%c0_23, %c0_24, %c0_25] : memref<1x16x128xf32, #tpu.memory_space<vmem>>, vector<1x16x128xf32>
    %42 = vector.shape_cast %41 : vector<1x16x128xf32> to vector<16x128xf32>
    %43 = vector.shape_cast %40 : vector<16x128xf32> to vector<1x16x128xf32>
    tpu.vector_store %arg4[%c0_23, %c0_24, %c0_25], %43 {strides = array<i32>} : memref<1x16x128xf32, #tpu.memory_space<vmem>>, vector<1x16x128xf32>,
    return
  }
  func.func @transform_1(%arg0: i32, %arg1: i32) -> (i32, i32, i32) {
    %c0_i32 = arith.constant 0 : i32
    %c0_i32_0 = arith.constant 0 : i32
    %c0_i32_1 = arith.constant 0 : i32
    return %arg0, %c0_i32, %c0_i32_0 : i32, i32, i32
  }
  func.func @transform_2(%arg0: i32, %arg1: i32) -> (i32, i32, i32) {
    %c0_i32 = arith.constant 0 : i32
    %c0_i32_0 = arith.constant 0 : i32
    return %arg0, %c0_i32, %arg1 : i32, i32, i32
  }
}

</mosaic_0001>

<bundles_post_ra>
// kernel: tpu_custom_call.1
= control target key start
LH: loop header
LB: loop body
LE: loop exit
PB: predicated region body
PF: predicated region fallthrough
CT: control target
= control target key end

     0   :  { %7 = vsyncpa [#allocation6], 0  ;;  %s877_s0 = inlined_call_operand.hbm [shape: f32[2,16,256], index: 0, kind: input, shape index: {}]   ;;  %s878_s1 = inlined_call_operand.hbm [shape: f32[2,16,48], index: 1, kind: input, shape index: {}]   ;;  %s879_s2 = inlined_call_operand.hbm [shape: f32[2,16,128], index: 2, kind: output, shape index: {}]  }
   0x1   :  { %9 = vsyncpa [#allocation6 + $0x1], 0 }
   0x2   :  { %10 = vsyncpa [#allocation7], 0 }
   0x3   :  { %12 = vsyncpa [#allocation7 + $0x1], 0  ;;  %s736_s9 = smov 0   ;;  %s738_s10 = smov 0  }
   0x4   :  { %s740_s11 = smov 0   ;;  %s742_s12 = smov 0  }
   0x5   :  { %s744_s13 = smov 0   ;;  %s746_s14 = smov 0  }
   0x6 LB: > { %s451_s15 = sadd.s32 4294967295, %s712_s14   ;;  %s452_s16 = sadd.s32 4294967294, %s712_s14   ;;  %s712_s14 = sphi %s746_s14, %s18_s14   ;;  %s708_s13 = sphi %s744_s13, %s888_s13   ;;  %s704_s12 = sphi %s742_s12, %s887_s12   ;;  %s700_s11 = sphi %s740_s11, %s886_s11   ;;  %s696_s10 = sphi %s738_s10, %s885_s10   ;;  %s692_s9 = sphi %s736_s9, %s884_s9  }
   0x7   : > { %s30_s17 = sadd.s32 1, %s708_s13  ;;  %s37_s18 = sadd.s32 1, %s700_s11 }
   0x8   : > { %p32_p0 = scmp.ge.s32.totalorder %s30_s17, 2  ;;  %p44_p1 = scmp.ne.s32.totalorder %s700_s11, %s696_s10 }
   0x9   : > { %p45_p2 = scmp.eq.s32.totalorder %s712_s14, 0  ;;  %p50_p3 = scmp.ne.s32.totalorder %s696_s10, %s692_s9 }
   0xa   : > { %s890_s17 = smov (%p32_p0, %s30_s17), 0  ;;  %p51_p5 = scmp.eq.s32.totalorder %s451_s15, 0 }
   0xb   : > { %p777_p4 = por %p45_p2, %p44_p1  ;;  %s34_s20 = ssub.s32 %s708_s13, %s890_s17 }
   0xc   : > { %p76_p6 = scmp.eq.s32.totalorder %s451_s15, 1  ;;  %p35_p7 = scmp.eq.s32.totalorder %s34_s20, 0 }
   0xd   : > { %p783_p8 = por %p51_p5, %p50_p3  ;;  %p82_p10 = scmp.eq.s32.totalorder %s452_s16, 1 }
   0xe   : > { %p787_p9 = por %p76_p6, %p44_p1  ;;  %p454_p12 = scmp.ge.s32.totalorder %s712_s14, 2 }
   0xf   : > { %s792_s23 = scalar_select %p35_p7, %s700_s11, %s37_s18  }
  0x10   : > { %p794_p11 = por %p82_p10, %p50_p3  ;;  %p497_p13 = scmp.lt.s32.totalorder %s712_s14, 2 }
  0x11   : > { %s102_s25 = sand.u32 1, %s700_s11   ;;  %s474_s27 = sshll.u32 %s708_s13, 4 }
  0x12   : > { %s455_s26 = sshll.u32 %s102_s25, 4  ;;  %s111_s30 = scalar_lea.hbm %s878_s1, %s474_s27 }
  0x13   : > { %s106_s3 = scalar_lea.vmem [#allocation5], %s455_s26  ;;  %s112_s5 = sshll.u32 %s111_s30, 4  ;;  %s113_s5 = int_to_ptr.hbm [resolvable:$true] %s112_s5 }
  0x14   : > { %s114_s4 = sshll.u32 %s106_s3, 4  ;;  %p490_p0 = pnand %p497_p13, %p777_p4  ;;  %s115_s4 = int_to_ptr.vmem [resolvable:$true] %s114_s4 }
  0x15   : > { %p458_p1 = scmp.ge.s32.totalorder %s712_s14, 1  ;;  %s103_s6 = scalar_lea.sflag [#allocation6], %s102_s25 }
  0x16   : > { %s714_s7 = smov 128   ;;  %s715_s8 = smov 8  }
  0x17   : > { %492 = dma.hbm_to_vmem [thread:$0]  (!%p490_p0), %s113_s5, 256, %s115_s4, %s103_s6, %s714_s7, %s714_s7, %s715_s8  }
  0x18   : > { %p122_p2 = scmp.lt.s32.totalorder %s712_s14, 3 }
  0x1a   : > { %p123_p3 = pnand %p458_p1, %p122_p2 }
  0x1b   : > { %s810_s15 = sand.u32 (!%p123_p3), 1, %s696_s10  }
  0x1c   : > { %126 = sbr.rel (%p123_p3) target bundleno = 318 (0x13e), region = 24  ;;  %s459_s16 = sshll.u32 (!%p123_p3), %s810_s15, 4 }
  0x1d   : > { %s129_s18 = scalar_lea.sflag (!%p123_p3), [#allocation6], %s810_s15  ;;  %s814_s20 = scalar_lea.vmem (!%p123_p3), [#allocation5], %s459_s16 }
  0x21   : > { %681 = dma.done.wait (%p783_p8), %s129_s18, 256  }
  0x22   : > { %683 = vsyncadd (%p783_p8), %s129_s18, 4294967040  ;;  %s475_s19 = sshll.u32 %s704_s12, 5  ;;  %s716_s29 = smov [#allocation2]  }
  0x23   : > { %s174_s27 = scalar_lea.hbm %s877_s0, %s475_s19  ;;  %s188_s30 = sshll.u32 %s716_s29, 4  ;;  %s189_s30 = int_to_ptr.vmem [resolvable:$true] %s188_s30 }
  0x24   : > { %s186_s28 = sshll.u32 %s174_s27, 4  ;;  %s608_s21 = scalar_lea.hbm %s877_s0, 64  ;;  %s187_s28 = int_to_ptr.hbm [resolvable:$true] %s186_s28 }
  0x25   : > { %s604_s3 = sshra.s32 %s187_s28, 4  ;;  %s605_s3 = int_to_ptr.hbm [resolvable:$true] %s604_s3 }
  0x26   : > { %s606_s4 = scalar_lea.hbm %s605_s3, 32  ;;  %p609_p5 = scmp.lt.s32.totalorder %s605_s3, %s877_s0 }
  0x27   : > { %p607_p4 = scmp.ne.s32.totalorder %s605_s3, %s606_s4  ;;  %p610_p6 = scmp.lt.s32.totalorder %s608_s21, %s606_s4 }
  0x29   : > { %p611_p7 = por %p610_p6, %p609_p5 }
  0x2b   : > { %p612_p8 = pnand %p611_p7, %p607_p4 }
  0x2d   : > { %615 = shalt.err (!%p612_p8)  }
  0x2e   : > { %191 = dma.hbm_to_vmem [thread:$0]  %s187_s28, 512, %s189_s30, [#allocation3] }
  0x2f   : > { %s830_s18 = scalar_lea.vmem [#allocation8], %s459_s16 }
  0x30   : > { %684 = dma.done.wait [#allocation3], 512 }
  0x31   : > { %685 = vsyncadd [#allocation3], 4294966784  ;;  %v260_v0 = vld [vmem:[#allocation2 + $0x10] sm:$0xff]  ;;  %v261_v1 = vld [vmem:[#allocation2 + $0x18] sm:$0xff]  ;;  %s717_s19 = smov 126   ;;  %s718_s25 = smov 127  }
  0x32   : > { %v554_v2 = vpack.i.bf16 %v261_v1, %v260_v0  ;;  %v258_v3 = vld [vmem:[#allocation2] sm:$0xff]  ;;  %v259_v4 = vld [vmem:[#allocation2 + $0x8] sm:$0xff]  ;;  %vm274_vm0 = vcmask 1031168   ;;  %vm251_vm1 = vcmask 1039360   ;;  %vm289_vm2 = vcmask 392192   ;;  %s478_s16 = sshll.u32 %s704_s12, 4 }
  0x33   : > { %v559_v5 = vpack.i.bf16 %v259_v4, %v258_v3  ;;  %v281_v22 = vld [vmem:[%s814_s20] sm:$0xff]  ;;  %v282_v23 = vld [vmem:[%s814_s20 + $0x8] sm:$0xff]  ;;  %s334_s28 = scalar_lea.hbm %s879_s2, %s478_s16  ;;  %s335_s29 = sshll.u32 %s830_s18, 4  ;;  %s336_s29 = int_to_ptr.vmem [resolvable:$true] %s335_s29 }
  0x34   : > { %555 = vrot.lane.b32.xlu0 %v554_v2, %s717_s19  ;;  %565 = vrot.lane.b32.xlu1 %v554_v2, %s718_s25  ;;  %s337_s30 = sshll.u32 %s334_s28, 4  ;;  %s322_s3 = scalar_lea.sflag [#allocation7], %s810_s15  ;;  %s338_s30 = int_to_ptr.hbm [resolvable:$true] %s337_s30 }
  0x35   : > { %s642_s20 = sshra.s32 %s338_s30, 4  ;;  %s648_s6 = scalar_lea.hbm %s879_s2, 32  ;;  %s643_s20 = int_to_ptr.hbm [resolvable:$true] %s642_s20 }
  0x36   : > { %s644_s4 = scalar_lea.hbm %s643_s20, 16  ;;  %p649_p1 = scmp.lt.s32.totalorder %s643_s20, %s879_s2 }
  0x37   : > { %p645_p10 = scmp.ne.s32.totalorder %s643_s20, %s644_s4  ;;  %p650_p2 = scmp.lt.s32.totalorder %s648_s6, %s644_s4 }
  0x39   : > { %p646_p13 = pnand %p645_p10, %p787_p9  ;;  %p651_p3 = por %p650_p2, %p649_p1 }
  0x3b   : > { %p647_p0 = pneg %p646_p13 }
  0x3c   : > { %560 = vrot.lane.b32.xlu0 %v559_v5, %s717_s19  ;;  %570 = vrot.lane.b32.xlu1 %v559_v5, %s718_s25 }
  0x3d   : > { %p652_p4 = pnand %p651_p3, %p647_p0 }
  0xa6   : > { %v556_v6 = vpop.permute.xlu0 %555  ;;  %v566_v7 = vpop.permute.xlu1 %565 }
  0xa7   : > { %v558_v8 = vunpack.i.h.bf16 %v556_v6  ;;  %v557_v9 = vunpack.i.l.bf16 %v556_v6  ;;  %v568_v11 = vunpack.i.h.bf16 %v566_v7  ;;  %v567_v12 = vunpack.i.l.bf16 %v566_v7 }
  0xa9   : > { %v276_v10 = vsel %vm274_vm0, %v557_v9, %v558_v8  ;;  %v253_v20 = vsel %vm251_vm1, %v567_v12, %v568_v11 }
  0xaa   : > { %306 = vmatpush.msra.mxu0 %v276_v10  ;;  %479 = vmatpush.msra.mxu1 %v276_v10 }
  0xae   : > { %v561_v13 = vpop.permute.xlu0 %560  ;;  %v571_v14 = vpop.permute.xlu1 %570 }
  0xaf   : > { %v563_v15 = vunpack.i.h.bf16 %v561_v13  ;;  %v562_v16 = vunpack.i.l.bf16 %v561_v13  ;;  %v573_v17 = vunpack.i.h.bf16 %v571_v14  ;;  %v572_v18 = vunpack.i.l.bf16 %v571_v14 }
  0xb1   : > { %v275_v19 = vsel %vm274_vm0, %v562_v16, %v563_v15  ;;  %v252_v21 = vsel %vm251_vm1, %v572_v18, %v573_v17 }
  0xb2   : > { %307 = vmatpush.msra.mxu0 %v275_v19  ;;  %480 = vmatpush.msra.mxu1 %v275_v19 }
  0xb4   : > { %308 = vmatpush.msra.mxu0 %v253_v20  ;;  %481 = vmatpush.msra.mxu1 %v253_v20 }
  0xb6   : > { %309 = vmatpush.msra.mxu0 %v252_v21  ;;  %482 = vmatpush.msra.mxu1 %v252_v21 }
  0xb8   : > { %310 = vmatpush.msra.mxu0 %v260_v0  ;;  %483 = vmatpush.msra.mxu1 %v260_v0 }
  0xba   : > { %311 = vmatpush.msra.mxu0 %v258_v3  ;;  %484 = vmatpush.msra.mxu1 %v258_v3 }
  0xbb   : > { %465 = vmatmul.msk.f32.vlgmr.msra.gmra.mxu0 %vm289_vm2, %v281_v22  ;;  %466 = vmatmul.msk.f32.vlgmr.msra.gmra.mxu1 %vm289_vm2, %v282_v23 }
 0x138   : > { %v313_v24 = vpop.f32.mrf.mxu0  ;;  %v316_v25 = vpop.f32.mrf.mxu1 }
 0x139   : > { %319 = vst [vmem:[%s830_s18] sm:$0xff] %v313_v24 }
 0x13a   : > { %320 = vst [vmem:[%s830_s18 + $0x8] sm:$0xff] %v316_v25 }
 0x13b   : > { %655 = shalt.err (!%p652_p4)
}
 0x13c   : > { %s719_s15 = smov 128   ;;  %s720_s8 = smov 8  }
 0x13d   : > { %487 = dma.vmem_to_hbm [thread:$0]  (%p787_p9), %s336_s29, 256, %s338_s30, %s322_s3, %s719_s15, %s719_s15, %s720_s8  }
 0x13e PF: > { %s352_s18 = sand.u32 1, %s692_s9   ;;  %p494_p5 = pnand %p454_p12, %p794_p11 }
 0x13f   : > { %s353_s19 = scalar_lea.sflag [#allocation7], %s352_s18 }
 0x140   : > { %p495_p6 = pneg %p494_p5 }
 0x142   : > { %687 = dma.done.wait (%p495_p6), %s353_s19, 256  }
 0x143   : > { %689 = vsyncadd (%p495_p6), %s353_s19, 4294967040  ;;  %s18_s14 = sadd.s32 1, %s712_s14   ;;  %s884_s9 = smov %s696_s10 }
 0x144   : > { %p15_p7 = scmp.ge.s32.totalorder %s18_s14, 4   ;;  %s885_s10 = smov %s700_s11 }
 0x145   : > { %s886_s11 = smov %s792_s23  ;;  %s887_s12 = smov %s708_s13 }
 0x146   : > { %s888_s13 = smov %s890_s17  ;;  %17 = sbr.rel (!%p15_p7) target bundleno = 6 (0x6), region = 94 }
 0x14b   :  { %359 = vsyncpa [#allocation6], 1 }
 0x14c   :  { %361 = vsyncpa [#allocation6 + $0x1], 1 }
 0x14d   :  { %362 = vsyncpa [#allocation7], 1 }
 0x14e   :  { %364 = vsyncpa [#allocation7 + $0x1], 1 }
 0x14f   :  { %365 = vsyncmov [#allocation3] }
 0x152   :  { %s366_s22 = vpop.sfrf %365 }
 0x153   :  { %p472_p9 = scmp.ne.s32.totalorder %s366_s22, 0 }
 0x155   :  { %370 = shalt.err (%p472_p9)  }
 0x156   :  { %372 = vsyncmov [#allocation3 + $0x1] }
 0x159   :  { %s373_s24 = vpop.sfrf %372 }
 0x15a   :  { %p473_p11 = scmp.ne.s32.totalorder %s373_s24, 0 }
 0x15c   :  { %377 = shalt.err (%p473_p11)  }

</bundles_post_ra>
